<compile_context>
chip_gen: v6e
topology: v6e:2x2x1
jax: 0.10.0
libtpu: 0.0.40
codegen_flags: <defaults>
</compile_context>

<pallas_src>
import functools

import jax
import jax.numpy as jnp
from jax.experimental import pallas as pl
from jax.experimental.pallas import tpu as pltpu


# --------------------------------------------------------------------------
# Kernel 1: text projection (Linear -> per-text conv filters), K-tiled.
#   w_mat[o, t*C + c] = (word @ wp + bp)[o, c*k*k + t]   (t = p*k + q)
# --------------------------------------------------------------------------
def _txt_proj_kernel(word_ref, wpw_ref, bpw_ref, wmat_ref):
    wmat_ref[...] = (
        jnp.dot(word_ref[...], wpw_ref[...],            # bf16 x bf16 -> f32 acc
                preferred_element_type=jnp.float32)
        + bpw_ref[...]
    ).astype(wmat_ref.dtype)                            # store bf16 (conv consumes bf16)


def _pick_tk(K, cap=1024):
    """Largest divisor of K that is a multiple of 128 and <= cap; else K (no tiling)."""
    best = None
    for t in range(128, min(K, cap) + 1, 128):
        if K % t == 0:
            best = t
    return best if best is not None else K


def txt_proj(word, wp, bp, C, k):
    """Returns (w_mat bf16 (B, k*k*C) in im2col column order, bias f32 (B, 1))."""
    B, D = word.shape
    K = C * k * k

    # One-time re-layout + cast of the *parameters* (tiny (D, K) arrays, plain XLA):
    #   wp_w[:, t*C + c] = wp[:, c*k*k + t]
    wp_w = (wp[:, :K].reshape(D, C, k * k).transpose(0, 2, 1)
            .reshape(D, K).astype(jnp.bfloat16))
    bp_w = bp[:K].reshape(C, k * k).T.reshape(1, K)       # f32, added post-accumulation
    word_bf = word.astype(jnp.bfloat16)

    # Scalar bias per text: a tiny plain-XLA mat-vec (no wasted N=1 MXU pass).
    bias = (word @ wp[:, K] + bp[K]).reshape(B, 1)        # f32 (B, 1)

    tk = _pick_tk(K)
    w_mat = pl.pallas_call(
        _txt_proj_kernel,
        out_shape=jax.ShapeDtypeStruct((B, K), jnp.bfloat16),
        grid=(K // tk,),
        in_specs=[
            pl.BlockSpec((B, D), lambda i: (0, 0)),
            pl.BlockSpec((D, tk), lambda i: (0, i)),
            pl.BlockSpec((1, tk), lambda i: (0, i)),
        ],
        out_specs=pl.BlockSpec((B, tk), lambda i: (0, i)),
        compiler_params=pltpu.CompilerParams(
            dimension_semantics=("parallel",),
            vmem_limit_bytes=48 * 1024 * 1024),
    )(word_bf, wp_w, bp_w)
    return w_mat, bias


# --------------------------------------------------------------------------
# Kernel 2: dynamic-filter conv2d (VALID, stride 1) without a materialized
#           im2col: k*k tap matmuls accumulated into a (Bo, N) f32 VMEM acc.
#   x block   : (bt, C, H*W + k-1)  bf16  -- spatial flat in lanes, right-padded
#   w block   : (Bo, k*k*C)         bf16  -- filters in im2col column order
#   b block   : (Bo, 1)             f32
#   out block : (bt, Bo, Ho*W)      f32   -- lane-dense; caller keeps cols j < Wo
# --------------------------------------------------------------------------
def _dyn_conv_kernel(x_ref, w_ref, b_ref, o_ref, acc_ref, *, k, C, W, N, bt):
    for img in range(bt):
        for t in range(k * k):
            p, q = t // k, t % k
            s = p * W + q                                  # static lane offset of tap
            partial = jnp.dot(w_ref[:, t * C:(t + 1) * C],  # (Bo, C) bf16
                              x_ref[img, :, s:s + N],        # (C, N)  bf16
                              preferred_element_type=jnp.float32)
            if t == 0:
                acc_ref[...] = partial
            else:
                acc_ref[...] += partial
        o_ref[img] = (acc_ref[...] + b_ref[...]).astype(o_ref.dtype)


def _pick_bt(B, per_img_bytes, fixed_bytes, budget=24 * 1024 * 1024):
    """Largest divisor of B fitting the VMEM budget, keeping >= 2 grid steps (v7x)."""
    best = 1
    for d in range(1, B + 1):
        if B % d:
            continue
        if B >= 2 and B // d < 2:        # keep the grid splittable across 2 TCs
            continue
        if 2 * d * per_img_bytes + fixed_bytes <= budget:
            best = d
    return best


def dynamic_conv2d(x, w_mat, bias, k, *, return_lane_padded=False):
    B, C, H, W = x.shape
    Bo, K = w_mat.shape
    Ho, Wo = H - k + 1, W - k + 1
    N = Ho * W                               # output columns per image (j >= Wo dropped)
    HWp = H * W + (k - 1)                    # right-pad so every tap slice is in bounds

    # bf16 cast + (k-1)-lane pad in one small XLA op (layout-preserving reshape is free).
    x_flat = jnp.pad(x.astype(jnp.bfloat16).reshape(B, C, H * W),
                     ((0, 0), (0, 0), (0, k - 1)))

    # Full VMEM accounting: double-buffered x/out blocks + (constant) w/bias + acc scratch.
    per_img = C * HWp * 2 + Bo * N * 4
    fixed = 2 * Bo * K * 2 + 2 * Bo * 4 + Bo * N * 4
    bt = _pick_bt(B, per_img, fixed)

    kernel = functools.partial(_dyn_conv_kernel, k=k, C=C, W=W, N=N, bt=bt)
    out_flat = pl.pallas_call(
        kernel,
        out_shape=jax.ShapeDtypeStruct((B, Bo, N), jnp.float32),
        grid=(B // bt,),
        in_specs=[
            pl.BlockSpec((bt, C, HWp), lambda b: (b, 0, 0)),
            pl.BlockSpec((Bo, K), lambda b: (0, 0)),
            pl.BlockSpec((Bo, 1), lambda b: (0, 0)),
        ],
        out_specs=pl.BlockSpec((bt, Bo, N), lambda b: (b, 0, 0)),
        scratch_shapes=[pltpu.VMEM((Bo, N), jnp.float32)],
        compiler_params=pltpu.CompilerParams(
            dimension_semantics=("parallel",),
            vmem_limit_bytes=48 * 1024 * 1024),
    )(x_flat, w_mat, bias)

    out = out_flat.reshape(B, Bo, Ho, W)      # layout-preserving reshape (free)
    if return_lane_padded:
        return out                            # lane-padded view for fusion downstream
    return out[:, :, :, :Wo]                  # drop padded columns j >= Wo


# --------------------------------------------------------------------------
# Projector forward
# --------------------------------------------------------------------------
def projector_forward(x, word, wp, bp, kernel_size=3, *, return_lane_padded=False):
    B, C, H, W = x.shape
    w_mat, bias = txt_proj(word, wp, bp, C, kernel_size)   # (B, k*k*C) bf16, (B, 1) f32
    return dynamic_conv2d(x, w_mat, bias, kernel_size,
                          return_lane_padded=return_lane_padded)


if __name__ == "__main__":
    # Small shapes consistent with the module:
    B = 2          # batch (also conv out-channels, per the module's F.conv2d call)
    in_dim = 4     # C
    word_dim = 32
    k = 3
    H = W = 16

    key = jax.random.PRNGKey(0)
    kx, kw, kp, kb = jax.random.split(key, 4)

    x = jax.random.normal(kx, (B, in_dim, H, W), dtype=jnp.float32)
    word = jax.random.normal(kw, (B, word_dim), dtype=jnp.float32)

    # Deterministic Linear params (PyTorch-style uniform(-1/sqrt(fan_in), ...))
    out_dim = in_dim * k * k + 1
    bound = 1.0 / (word_dim ** 0.5)
    wp = jax.random.uniform(kp, (word_dim, out_dim), jnp.float32, -bound, bound)
    bp = jax.random.uniform(kb, (out_dim,), jnp.float32, -bound, bound)

    out = projector_forward(x, word, wp, bp, kernel_size=k)
    out = jax.block_until_ready(out)
    assert out.shape == (B, B, H - k + 1, W - k + 1), out.shape

    K = in_dim * k * k

    # Reference 1: mirrors the kernel's bf16 MXU inputs / f32 accumulation exactly.
    proj_w = (jnp.dot(word.astype(jnp.bfloat16), wp[:, :K].astype(jnp.bfloat16),
                      preferred_element_type=jnp.float32) + bp[:K])
    ref_w = proj_w.astype(jnp.bfloat16).reshape(B, in_dim, k, k)
    ref_b = word @ wp[:, K] + bp[K]
    ref_mirror = jax.lax.conv_general_dilated(
        x.astype(jnp.bfloat16), ref_w, window_strides=(1, 1), padding="VALID",
        dimension_numbers=("NCHW", "OIHW", "NCHW"),
        preferred_element_type=jnp.float32,
    ) + ref_b[None, :, None, None]
    assert jnp.allclose(out, ref_mirror, atol=2e-2, rtol=2e-2), "mismatch vs bf16 reference"

    # Reference 2: pure-f32 PyTorch semantics (looser tol to allow bf16 MXU inputs).
    proj_f32 = word @ wp + bp
    ref_w32 = proj_f32[:, :-1].reshape(B, in_dim, k, k)
    ref_b32 = proj_f32[:, -1]
    ref_f32 = jax.lax.conv_general_dilated(
        x, ref_w32, window_strides=(1, 1), padding="VALID",
        dimension_numbers=("NCHW", "OIHW", "NCHW"),
    ) + ref_b32[None, :, None, None]
    assert jnp.allclose(out, ref_f32, atol=6e-2, rtol=6e-2), "mismatch vs f32 reference"

    print("KERNEL_OK")
</pallas_src>

<mosaic_0001>
module attributes {stable_mosaic.version = 11 : i64} {
  func.func @_txt_proj_kernel(%arg0: i32, %arg1: memref<2x32xbf16, #tpu.memory_space<vmem>>, %arg2: memref<32x36xbf16, #tpu.memory_space<vmem>>, %arg3: memref<1x36xf32, #tpu.memory_space<vmem>>, %arg4: memref<2x36xbf16, #tpu.memory_space<vmem>>) attributes {dimension_semantics = [#tpu.dimension_semantics<parallel>], iteration_bounds = array<i64: 1>, scalar_prefetch = 0 : i64, scratch_operands = 0 : i64, tpu.core_type = #tpu.core_type<tc>, window_params = [{pipeline_mode = #tpu.pipeline_mode<synchronous>, transform_indices = @transform_0, window_bounds = array<i64: 2, 32>}, {transform_indices = @transform_1, window_bounds = array<i64: 32, 36>}, {transform_indices = @transform_2, window_bounds = array<i64: 1, 36>}, {transform_indices = @transform_3, window_bounds = array<i64: 2, 36>}]} {
    %c0 = arith.constant 0 : index
    %c0_0 = arith.constant 0 : index
    %0 = vector.load %arg1[%c0, %c0_0] : memref<2x32xbf16, #tpu.memory_space<vmem>>, vector<2x32xbf16>
    %c0_1 = arith.constant 0 : index
    %c0_2 = arith.constant 0 : index
    %1 = vector.load %arg2[%c0_1, %c0_2] : memref<32x36xbf16, #tpu.memory_space<vmem>>, vector<32x36xbf16>
    %cst = arith.constant dense<0.000000e+00> : vector<2x36xf32>
    %2 = tpu.matmul %0, %1, %cst {dimension_numbers = #tpu.dot_dimension_numbers<[1], [0], [0], [1], [0, 0, 1, 1], [], []>} : vector<2x32xbf16>, vector<32x36xbf16>, vector<2x36xf32> -> vector<2x36xf32>
    %c0_3 = arith.constant 0 : index
    %c0_4 = arith.constant 0 : index
    %3 = vector.load %arg3[%c0_3, %c0_4] : memref<1x36xf32, #tpu.memory_space<vmem>>, vector<1x36xf32>
    %4 = vector.broadcast %3 : vector<1x36xf32> to vector<2x36xf32>
    %5 = arith.addf %2, %4 : vector<2x36xf32>
    %6 = arith.truncf %5 : vector<2x36xf32> to vector<2x36xbf16>
    %c0_5 = arith.constant 0 : index
    %c0_6 = arith.constant 0 : index
    %7 = vector.load %arg4[%c0_5, %c0_6] : memref<2x36xbf16, #tpu.memory_space<vmem>>, vector<2x36xbf16>
    tpu.vector_store %arg4[%c0_5, %c0_6], %6 {strides = array<i32>} : memref<2x36xbf16, #tpu.memory_space<vmem>>, vector<2x36xbf16>,
    return
  }
  func.func @transform_0(%arg0: i32) -> (i32, i32) {
    %c0_i32 = arith.constant 0 : i32
    %c0_i32_0 = arith.constant 0 : i32
    %c0_i32_1 = arith.constant 0 : i32
    return %c0_i32, %c0_i32_0 : i32, i32
  }
  func.func @transform_1(%arg0: i32) -> (i32, i32) {
    %c0_i32 = arith.constant 0 : i32
    %c0_i32_0 = arith.constant 0 : i32
    return %c0_i32, %arg0 : i32, i32
  }
  func.func @transform_2(%arg0: i32) -> (i32, i32) {
    %c0_i32 = arith.constant 0 : i32
    %c0_i32_0 = arith.constant 0 : i32
    return %c0_i32, %arg0 : i32, i32
  }
  func.func @transform_3(%arg0: i32) -> (i32, i32) {
    %c0_i32 = arith.constant 0 : i32
    %c0_i32_0 = arith.constant 0 : i32
    return %c0_i32, %arg0 : i32, i32
  }
}

</mosaic_0001>

<bundles_post_ra>
// kernel: tpu_custom_call.1
= control target key start
LH: loop header
LB: loop body
LE: loop exit
PB: predicated region body
PF: predicated region fallthrough
CT: control target
= control target key end

     0   :  { %8 = vsyncpa [#allocation3], 0  ;;  %s258_s0 = inlined_call_operand.hbm [shape: bf16[2,32], index: 0, kind: input, shape index: {}]   ;;  %s259_s1 = inlined_call_operand.hbm [shape: bf16[32,36], index: 1, kind: input, shape index: {}]   ;;  %s260_s2 = inlined_call_operand.vmem [shape: f32[1,36], index: 2, kind: input, shape index: {}]   ;;  %s261_s3 = inlined_call_operand.hbm [shape: bf16[2,36], index: 3, kind: output, shape index: {}]  }
   0x1   :  { %9 = vsyncpa [#allocation6], 0 }
   0x2   :  { %10 = vsyncpa [#allocation4], 0  ;;  %s219_s12 = smov [#allocation2]   ;;  %s220_s14 = smov [#allocation5]  }
   0x3   :  { %s17_s13 = sshll.u32 %s219_s12, 4  ;;  %s26_s15 = sshll.u32 %s220_s14, 4  ;;  %s18_s13 = int_to_ptr.vmem [resolvable:$true] %s17_s13  ;;  %s27_s15 = int_to_ptr.vmem [resolvable:$true] %s26_s15 }
   0x4   :  { %s161_s16 = scalar_lea.vmem %s18_s13, 16  ;;  %s165_s17 = scalar_lea.vmem %s18_s13, 32 }
   0x5   :  { %p162_p0 = scmp.ne.s32.totalorder %s18_s13, %s161_s16  ;;  %p166_p1 = scmp.lt.s32.totalorder %s18_s13, %s18_s13 }
   0x6   :  { %p167_p2 = scmp.lt.s32.totalorder %s165_s17, %s161_s16 }
   0x8   :  { %p168_p3 = por %p167_p2, %p166_p1 }
   0xa   :  { %p169_p4 = pnand %p168_p3, %p162_p0 }
   0xc   :  { %172 = shalt.err (!%p169_p4)
}
   0xd   :  { %20 = dma.hbm_to_vmem [thread:$0]  %s258_s0, 16, %s18_s13, [#allocation3]  }
   0xe   :  { %s181_s20 = scalar_lea.vmem %s27_s15, 256  ;;  %p186_p6 = scmp.lt.s32.totalorder %s27_s15, %s27_s15 }
   0xf   :  { %p182_p5 = scmp.ne.s32.totalorder %s27_s15, %s181_s20  ;;  %p187_p7 = scmp.lt.s32.totalorder %s181_s20, %s181_s20 }
  0x11   :  { %p188_p8 = por %p187_p7, %p186_p6 }
  0x13   :  { %p189_p9 = pnand %p188_p8, %p182_p5 }
  0x15   :  { %192 = shalt.err (!%p189_p9)
}
  0x16   :  { %s221_s21 = smov 64   ;;  %s222_s22 = smov 4  }
  0x17   :  { %32 = dma.hbm_to_vmem [thread:$0]  %s259_s1, 256, %s27_s15, [#allocation6], %s221_s21, %s221_s21, %s222_s22  }
  0x18   :  { %213 = dma.done.wait [#allocation3], 16  }
  0x19   :  { %214 = vsyncadd [#allocation3], 4294967280 }
  0x1a   :  { %215 = dma.done.wait [#allocation6], 256  }
  0x1b   :  { %216 = vsyncadd [#allocation6], 4294967040  ;;  %v223_v0 = vmov 0.0   ;;  %vm224_vm0 = vmmov 0   ;;  %v151_v1 = vld [vmem:[#allocation5 + $0x8] sm:$0xff]   ;;  %v152_v2 = vld [vmem:[#allocation5] sm:$0xff]  }
  0x1c   :  { %136 = vmatprep.subr.bf16.mxu0 %v223_v0  ;;  %140 = vmatprep.mubr.msk.bf16.mxu0 %vm224_vm0, %v223_v0  ;;  %v42_v3 = vld [vmem:[#allocation2] sm:$0x1]  ;;  %vm66_vm1 = vcmask 261120   ;;  %s225_s1 = smov [#allocation7]   ;;  %vm111_vm2 = vcmask 286720  }
  0x1d   :  { %137 = vmatpush3.bf16.msra.mxu0 %v151_v1  ;;  %v129_v4 = vld [vmem:[%s260_s2] ss:$0 sm:$0xff]  ;;  %s119_s26 = sshll.u32 %s225_s1, 4  ;;  %s120_s26 = int_to_ptr.vmem [resolvable:$true] %s119_s26 }
  0x1e   :  { %138 = vmatprep.subr.bf16.mxu0 %v223_v0  ;;  %s193_s27 = scalar_lea.vmem %s120_s26, 16  ;;  %s197_s28 = scalar_lea.vmem %s120_s26, 32 }
  0x1f   :  { %p194_p10 = scmp.ne.s32.totalorder %s120_s26, %s193_s27  ;;  %p198_p11 = scmp.lt.s32.totalorder %s120_s26, %s120_s26 }
  0x20   :  { %p199_p12 = scmp.lt.s32.totalorder %s197_s28, %s193_s27 }
  0x21   :  { %139 = vmatpush3.bf16.msra.mxu0 %v152_v2 }
  0x22   :  { %p200_p13 = por %p199_p12, %p198_p11 }
  0x24   :  { %141 = vmatmul.mubr.msk.bf16.vlgmr.msra.gmra.mxu0 %vm66_vm1, %v42_v3  ;;  %p201_p0 = pnand %p200_p13, %p194_p10 }
  0xe4   :  { %v104_v5 = vpop.f32.mrf.mxu0 }
  0xe5   :  { %v105_v6 = vadd.f32 %v129_v4, %v104_v5 }
  0xe6   :  { %v142_v7 = vpop.f32.mrf.mxu0 }
  0xe7   :  { %v110_v8 = vpack.c.bf16 %v105_v6, %v105_v6 }
  0xe8   :  { %v107_v9 = vpop.f32.mrf.mxu0 }
  0xe9   :  { %112 = vst.msk [vmem:[#allocation7] sm:$0x1] %vm111_vm2, %v110_v8 }
  0xea   :  { %v143_v10 = vpop.f32.mrf.mxu0 }
  0xeb   :  { %204 = shalt.err (!%p201_p0)
}
  0xec   :  { %122 = dma.vmem_to_hbm [thread:$0]  %s120_s26, 16, %s261_s3, [#allocation4]  }
  0xed   :  { %217 = dma.done.wait [#allocation4], 16  }
  0xee   :  { %218 = vsyncadd [#allocation4], 4294967280 }
  0xef   :  { %126 = vsyncpa [#allocation3], 1 }
  0xf0   :  { %127 = vsyncpa [#allocation6], 1 }
  0xf1   :  { %128 = vsyncpa [#allocation4], 1 }

</bundles_post_ra>
